<compile_context>
chip_gen: v5e
topology: v5e:2x2
jax: 0.10.0
libtpu: 0.0.40
codegen_flags: <defaults>
</compile_context>

<pallas_src>
import math

import jax
import jax.numpy as jnp
from jax.experimental import pallas as pl
from jax.experimental.pallas import tpu as pltpu


def _rfe_kernel(x_ref, w_ref, p_ref, o_ref):
    # x_ref: (TB, 1)     batch tile of scalar inputs (times)
    # w_ref: (1, 2H)     2*pi*[w, w]
    # p_ref: (1, 2H)     phase [0...0, pi/2...pi/2]
    # o_ref: (TB, 2H+1)  output block: [x | sin(2*pi*x*w) | cos(2*pi*x*w)]
    x = x_ref[...].astype(jnp.float32)            # (TB, 1)
    w = w_ref[...].astype(jnp.float32)            # (1, 2H)
    p = p_ref[...].astype(jnp.float32)            # (1, 2H)

    # One transcendental stream over a contiguous slab: sin | cos via phase.
    sincos = jnp.sin(x * w + p)                   # (TB, 2H)

    # Direct slice stores -- no concatenate, no extra VMEM temp.
    o_ref[:, :1] = x.astype(o_ref.dtype)
    o_ref[:, 1:] = sincos.astype(o_ref.dtype)


def _sublane_multiple(dtype):
    # f32 -> 8, bf16 -> 16, int8/fp8 -> 32 (sublane packing of partial blocks)
    return max(8, 32 // jnp.dtype(dtype).itemsize)


def random_fourier_embed(x, weights, *, out_dtype=None, block_rows=None,
                         target_block_bytes=2 * 1024 * 1024):
    """x: (B,); weights: (dim//2,) -> (B, dim + 1) = [x, sin, cos]."""
    B = x.shape[0]
    H = weights.shape[0]
    out_dim = 2 * H + 1
    out_dtype = x.dtype if out_dtype is None else jnp.dtype(out_dtype)

    sub = max(_sublane_multiple(x.dtype), _sublane_multiple(out_dtype))

    # Batch tile: ~target_block_bytes per output block (memory-bound op;
    # per-grid-step overhead ~0.35us, so a few-MB blocks ≈ HBM roofline).
    if block_rows is None:
        row_bytes = out_dim * max(4, jnp.dtype(out_dtype).itemsize)  # f32 temps dominate
        tb = max(sub, (target_block_bytes // row_bytes) // sub * sub)
    else:
        tb = max(sub, (int(block_rows) // sub) * sub)

    if tb >= B:
        tb = B                      # single whole-batch block (always legal)
        grid_b = 1
    else:
        grid_b = pl.cdiv(B, tb)     # ragged last block handled by Pallas

    # Tiny host-side prep (no per-element HBM pass over x):
    wf = weights.astype(jnp.float32)
    w2 = (jnp.concatenate([wf, wf]) * jnp.float32(2.0 * math.pi)).reshape(1, 2 * H)
    phase = jnp.concatenate(
        [jnp.zeros((H,), jnp.float32),
         jnp.full((H,), jnp.float32(math.pi / 2.0))]).reshape(1, 2 * H)
    x2 = x.reshape(B, 1)            # metadata-only reshape

    itemsize_out = jnp.dtype(out_dtype).itemsize
    cost = pl.CostEstimate(
        flops=int(4 * B * H),                 # mul + add over the (B, 2H) slab
        transcendentals=int(2 * B * H),       # one sin per slab element
        bytes_accessed=int(B * x2.dtype.itemsize
                           + 2 * (2 * H) * 4
                           + B * out_dim * itemsize_out),
    )

    return pl.pallas_call(
        _rfe_kernel,
        out_shape=jax.ShapeDtypeStruct((B, out_dim), out_dtype),
        grid=(grid_b,),
        in_specs=[
            pl.BlockSpec((tb, 1), lambda i: (i, 0)),       # batch tile of x
            pl.BlockSpec((1, 2 * H), lambda i: (0, 0)),    # 2*pi*[w, w] (broadcast)
            pl.BlockSpec((1, 2 * H), lambda i: (0, 0)),    # phase
        ],
        out_specs=pl.BlockSpec((tb, out_dim), lambda i: (i, 0)),
        compiler_params=pltpu.CompilerParams(
            dimension_semantics=("parallel",)),            # megacore-splittable
        cost_estimate=cost,
    )(x2, w2, phase)


def _reference(x, weights):
    """Plain-JAX reference matching the PyTorch forward semantics."""
    xf = x.astype(jnp.float32)
    wf = weights.astype(jnp.float32)
    freqs = xf[:, None] * wf[None, :] * jnp.float32(2.0 * math.pi)
    out = jnp.concatenate([xf[:, None], jnp.sin(freqs), jnp.cos(freqs)], axis=-1)
    return out.astype(x.dtype)


if __name__ == "__main__":
    key = jax.random.PRNGKey(0)
    kx, kw, kx2, kx3 = jax.random.split(key, 4)

    dim = 32
    H = dim // 2
    weights = jax.random.normal(kw, (H,), jnp.float32)   # ~ torch.randn(dim // 2)

    # (1) Module-sized case: batch of 2 scalar times, single block.
    x = jax.random.uniform(kx, (2,), jnp.float32)
    out = jax.block_until_ready(random_fourier_embed(x, weights))
    assert out.shape == (2, dim + 1)
    assert jnp.allclose(out, _reference(x, weights), atol=3e-5, rtol=1e-5), \
        "mismatch vs reference (small case)"

    # (2) Multi-tile grid path (2 batch tiles).
    xb = jax.random.uniform(kx2, (16,), jnp.float32)
    outb = jax.block_until_ready(random_fourier_embed(xb, weights, block_rows=8))
    assert outb.shape == (16, dim + 1)
    assert jnp.allclose(outb, _reference(xb, weights), atol=3e-5, rtol=1e-5), \
        "mismatch vs reference (tiled case)"

    # (3) Ragged batch (B not a multiple of the tile): cdiv grid, partial last block.
    xr = jax.random.uniform(kx3, (20,), jnp.float32)
    outr = jax.block_until_ready(random_fourier_embed(xr, weights, block_rows=8))
    assert outr.shape == (20, dim + 1)
    assert jnp.allclose(outr, _reference(xr, weights), atol=3e-5, rtol=1e-5), \
        "mismatch vs reference (ragged case)"

    print("KERNEL_OK")
</pallas_src>

<mosaic_0001>
module attributes {stable_mosaic.version = 11 : i64} {
  func.func @_rfe_kernel(%arg0: i32, %arg1: memref<2x1xf32, #tpu.memory_space<vmem>>, %arg2: memref<1x32xf32, #tpu.memory_space<vmem>>, %arg3: memref<1x32xf32, #tpu.memory_space<vmem>>, %arg4: memref<2x33xf32, #tpu.memory_space<vmem>>) attributes {dimension_semantics = [#tpu.dimension_semantics<parallel>], iteration_bounds = array<i64: 1>, scalar_prefetch = 0 : i64, scratch_operands = 0 : i64, tpu.core_type = #tpu.core_type<tc>, window_params = [{transform_indices = @transform_0, window_bounds = array<i64: 2, 1>}, {pipeline_mode = #tpu.pipeline_mode<synchronous>, transform_indices = @transform_1, window_bounds = array<i64: 1, 32>}, {pipeline_mode = #tpu.pipeline_mode<synchronous>, transform_indices = @transform_2, window_bounds = array<i64: 1, 32>}, {transform_indices = @transform_3, window_bounds = array<i64: 2, 33>}]} {
    %c0 = arith.constant 0 : index
    %c0_0 = arith.constant 0 : index
    %0 = vector.load %arg1[%c0, %c0_0] : memref<2x1xf32, #tpu.memory_space<vmem>>, vector<2x1xf32>
    %c0_1 = arith.constant 0 : index
    %c0_2 = arith.constant 0 : index
    %1 = vector.load %arg2[%c0_1, %c0_2] : memref<1x32xf32, #tpu.memory_space<vmem>>, vector<1x32xf32>
    %c0_3 = arith.constant 0 : index
    %c0_4 = arith.constant 0 : index
    %2 = vector.load %arg3[%c0_3, %c0_4] : memref<1x32xf32, #tpu.memory_space<vmem>>, vector<1x32xf32>
    %3 = vector.broadcast %0 : vector<2x1xf32> to vector<2x32xf32>
    %4 = vector.broadcast %1 : vector<1x32xf32> to vector<2x32xf32>
    %5 = arith.mulf %3, %4 : vector<2x32xf32>
    %6 = vector.broadcast %2 : vector<1x32xf32> to vector<2x32xf32>
    %7 = arith.addf %5, %6 : vector<2x32xf32>
    %8 = math.sin %7 : vector<2x32xf32>
    %c0_5 = arith.constant 0 : index
    %c0_6 = arith.constant 0 : index
    %9 = vector.load %arg4[%c0_5, %c0_6] : memref<2x33xf32, #tpu.memory_space<vmem>>, vector<2x1xf32>
    tpu.vector_store %arg4[%c0_5, %c0_6], %0 {strides = array<i32>} : memref<2x33xf32, #tpu.memory_space<vmem>>, vector<2x1xf32>,
    %c0_7 = arith.constant 0 : index
    %c1 = arith.constant 1 : index
    %10 = vector.load %arg4[%c0_7, %c1] : memref<2x33xf32, #tpu.memory_space<vmem>>, vector<2x32xf32>
    tpu.vector_store %arg4[%c0_7, %c1], %8 {strides = array<i32>} : memref<2x33xf32, #tpu.memory_space<vmem>>, vector<2x32xf32>,
    return
  }
  func.func @transform_0(%arg0: i32) -> (i32, i32) {
    %c0_i32 = arith.constant 0 : i32
    %c0_i32_0 = arith.constant 0 : i32
    return %arg0, %c0_i32 : i32, i32
  }
  func.func @transform_1(%arg0: i32) -> (i32, i32) {
    %c0_i32 = arith.constant 0 : i32
    %c0_i32_0 = arith.constant 0 : i32
    %c0_i32_1 = arith.constant 0 : i32
    return %c0_i32, %c0_i32_0 : i32, i32
  }
  func.func @transform_2(%arg0: i32) -> (i32, i32) {
    %c0_i32 = arith.constant 0 : i32
    %c0_i32_0 = arith.constant 0 : i32
    %c0_i32_1 = arith.constant 0 : i32
    return %c0_i32, %c0_i32_0 : i32, i32
  }
  func.func @transform_3(%arg0: i32) -> (i32, i32) {
    %c0_i32 = arith.constant 0 : i32
    %c0_i32_0 = arith.constant 0 : i32
    return %arg0, %c0_i32 : i32, i32
  }
}

</mosaic_0001>

<bundles_post_ra>
// kernel: tpu_custom_call.1
= control target key start
LH: loop header
LB: loop body
LE: loop exit
PB: predicated region body
PF: predicated region fallthrough
CT: control target
= control target key end

     0   :  { %vm186_vm0 = vcmask 1024   ;;  %v251_v1 = vmov 0   ;;  %s351_s0 = inlined_call_operand.vmem [shape: f32[2,1], index: 0, kind: input, shape index: {}]   ;;  %s352_s1 = inlined_call_operand.vmem [shape: f32[1,32], index: 1, kind: input, shape index: {}]   ;;  %s353_s2 = inlined_call_operand.vmem [shape: f32[1,32], index: 2, kind: input, shape index: {}]   ;;  %s354_s3 = inlined_call_operand.hbm [shape: f32[2,33], index: 3, kind: output, shape index: {}]  }
   0x1   :  { %v15_v0 = vld [vmem:[%s351_s0] sm:$0x3]  ;;  %222 = vset.pattern.permute.xlu0 %v251_v1 }
   0x2   :  { %187 = vst.msk [vmem:[#allocation2] sm:$0x3] %vm186_vm0, %v15_v0  ;;  %20 = vperm.xlu0 %222, %v15_v0  }
   0x3   :  { %8 = vsyncpa [#allocation3], 0  ;;  %v223_v2 = vld [vmem:[%s352_s1] ss:$0 sm:$0xff]  ;;  %v252_v18 = vmov 2102212464  }
   0x4   :  { %v224_v3 = vld [vmem:[%s353_s2] ss:$0 sm:$0xff]  ;;  %v253_v20 = vmov 920167782   ;;  %v254_v23 = vmov 1326507024  }
   0x5   :  { %v255_v25 = vmov 683565275   ;;  %v256_v27 = vmov 2475754826   ;;  %v257_v30 = vmov 2131351028  }
   0x6   :  { %s258_s0 = smov 1   ;;  %s259_s1 = smov [#allocation2]  }
   0x7   :  { %s199_s2 = sshll.u32 %s259_s1, 4  ;;  %s201_s20 = sshll.u32 %s354_s3, 4  ;;  %s200_s2 = int_to_ptr.vmem [resolvable:$true] %s199_s2  ;;  %s202_s20 = int_to_ptr.hbm [resolvable:$true] %s201_s20 }
  0x74   :  { %v21_v4 = vpop.permute.xlu0 %20 }
  0x75   :  { %v26_v5 = vmul.f32 %v223_v2, %v21_v4 }
  0x77   :  { %v290_v6 = vadd.f32 %v224_v3, %v26_v5 }
  0x79   :  { %v34_v7 = vand.u32 2139095040, %v290_v6  ;;  %v31_v10 = vand.u32 2147483647, %v290_v6  ;;  %vm33_vm13 = vcmp.lt.s32.totalorder %v290_v6, 0 }
  0x7b   :  { %v35_v8 = vshrl.u32 %v34_v7, 23  ;;  %v38_v12 = vand.u32 8388607, %v31_v10  ;;  %vm32_vm14 = vcmp.le.f32.partialorder %v31_v10, 0.7853982 }
  0x7d   :  { %v210_v9 = vadd.s32 4294967169, %v35_v8  ;;  %v39_v16 = vor.u32 8388608, %v38_v12 }
  0x7f   :  { %v41_v11 = vadd.s32 1, %v210_v9  ;;  %v305_v37 = vshll.u32 %v39_v16, 8 }
  0x81   :  { %vm42_vm1 = vcmp.gt.s32.totalorder %v41_v11, 0  ;;  %v80_v47 = vand.u32 65535, %v305_v37  ;;  %v81_v49 = vshrl.u32 %v305_v37, 16 }
  0x82   :  { %v43_v13 = vsel %vm42_vm1, %v41_v11, 0 }
  0x83   :  { %v45_v14 = vand.u32 31, %v43_v13  ;;  %v298_v17 = vshrl.u32 %v43_v13, 5 }
  0x85   :  { %v296_v15 = vsub.s32 32, %v45_v14  ;;  %v57_v19 = vshll.u32 %v252_v18, %v45_v14  ;;  %v60_v21 = vshll.u32 %v253_v20, %v45_v14  ;;  %v48_v26 = vshll.u32 %v255_v25, %v45_v14 }
  0x86   :  { %v51_v29 = vshll.u32 %v256_v27, %v45_v14  ;;  %v54_v32 = vshll.u32 %v257_v30, %v45_v14  ;;  %vm66_vm2 = vcmp.lt.s32.totalorder %v298_v17, 4  ;;  %vm63_vm3 = vcmp.lt.s32.totalorder %v298_v17, 1 }
  0x87   :  { %v58_v22 = vshrl.u32 %v253_v20, %v296_v15  ;;  %v61_v24 = vshrl.u32 %v254_v23, %v296_v15  ;;  %v49_v28 = vshrl.u32 %v256_v27, %v296_v15  ;;  %v52_v31 = vshrl.u32 %v257_v30, %v296_v15 }
  0x88   :  { %v55_v33 = vshrl.u32 %v252_v18, %v296_v15  ;;  %vm65_vm4 = vcmp.lt.s32.totalorder %v298_v17, 3  ;;  %vm64_vm5 = vcmp.lt.s32.totalorder %v298_v17, 2  ;;  %v47_v11 = vshrl.u32 %v255_v25, %v296_v15 }
  0x89   :  { %v59_v34 = vor.u32 %v58_v22, %v57_v19  ;;  %v62_v35 = vor.u32 %v61_v24, %v60_v21  ;;  %v50_v36 = vor.u32 %v49_v28, %v48_v26  ;;  %v53_v38 = vor.u32 %v52_v31, %v51_v29 }
  0x8a   :  { %v56_v39 = vor.u32 %v55_v33, %v54_v32 }
  0x8b   :  { %v72_v40 = vsel %vm66_vm2, %v59_v34, 920167782  ;;  %v76_v41 = vsel %vm66_vm2, %v62_v35, 1326507024  ;;  %v71_v42 = vsel %vm63_vm3, %v50_v36, %v53_v38  ;;  %v67_v19 = vsel %vm63_vm3, %v47_v11, %v50_v36 }
  0x8c   :  { %v73_v43 = vsel %vm65_vm4, %v56_v39, %v72_v40  ;;  %v75_v44 = vsel %vm63_vm3, %v53_v38, %v56_v39  ;;  %v77_v46 = vsel %vm65_vm4, %v59_v34, %v76_v41  ;;  %v68_v7 = vsel %vm66_vm2, %v56_v39, 2102212464 }
  0x8d   :  { %v74_v45 = vsel %vm64_vm5, %v71_v42, %v73_v43  ;;  %v78_v48 = vsel %vm64_vm5, %v75_v44, %v77_v46  ;;  %v69_v20 = vsel %vm65_vm4, %v53_v38, %v68_v7  ;;  %vm174_vm2 = vweird.f32 %v290_v6 }
  0x8e   :  { %v104_v50 = vand.u32 65535, %v74_v45  ;;  %v105_v51 = vshrl.u32 %v74_v45, 16  ;;  %v82_v52 = vand.u32 65535, %v78_v48  ;;  %v83_v53 = vshrl.u32 %v78_v48, 16 }
  0x8f   :  { %v70_v25 = vsel %vm64_vm5, %v67_v19, %v69_v20  ;;  %vm192_vm3 = vcmask 263176  }
  0x90   :  { %v107_v54 = vmul.u32 %v105_v51, %v80_v47  ;;  %v108_v55 = vmul.u32 %v104_v50, %v81_v49  ;;  %v85_v56 = vmul.u32 %v83_v53, %v80_v47  ;;  %v86_v57 = vmul.u32 %v82_v52, %v81_v49 }
  0x91   :  { %v106_v58 = vmul.u32 %v104_v50, %v80_v47  ;;  %v84_v60 = vmul.u32 %v82_v52, %v80_v47  ;;  %v109_v62 = vmul.u32 %v105_v51, %v81_v49  ;;  %v87_v63 = vmul.u32 %v83_v53, %v81_v49 }
  0x92   :  { %v110_v59 = vshll.u32 %v107_v54, 16  ;;  %v88_v61 = vshll.u32 %v85_v56, 16  ;;  %v112_v0 = vshll.u32 %v108_v55, 16  ;;  %v90_v3 = vshll.u32 %v86_v57, 16 }
  0x93   :  { %v111_v16 = vshrl.u32 %v107_v54, 16  ;;  %v89_v21 = vshrl.u32 %v85_v56, 16  ;;  %v113_v23 = vshrl.u32 %v108_v55, 16  ;;  %v91_v26 = vshrl.u32 %v86_v57, 16 }
  0x94   :  { %vm114_vm6 = vc.u32 %v106_v58, %v110_v59  ;;  %v116_v2 = vadd.s32 %v110_v59, %v106_v58  ;;  %vm92_vm7 = vc.u32 %v84_v60, %v88_v61  ;;  %v94_v4 = vadd.s32 %v88_v61, %v84_v60 }
  0x95   :  { %v115_v5 = vsel %vm114_vm6, 1, %v251_v1  ;;  %v93_v8 = vsel %vm92_vm7, 1, %v251_v1  ;;  %v124_v30 = vmul.u32 %v305_v37, %v70_v25 }
  0x96   :  { %v117_v9 = vadd.s32 %v115_v5, %v109_v62  ;;  %vm118_vm8 = vc.u32 %v116_v2, %v112_v0  ;;  %v95_v12 = vadd.s32 %v93_v8, %v87_v63  ;;  %vm96_vm9 = vc.u32 %v94_v4, %v90_v3 }
  0x97   :  { %v119_v13 = vsel %vm118_vm8, 1, %v251_v1  ;;  %v97_v14 = vsel %vm96_vm9, 1, %v251_v1  ;;  %v120_v1 = vadd.s32 %v116_v2, %v112_v0 }
  0x98   :  { %v121_v18 = vadd.s32 %v119_v13, %v117_v9  ;;  %v99_v22 = vadd.s32 %v97_v14, %v95_v12 }
  0x9a   :  { %v122_v24 = vadd.s32 %v121_v18, %v111_v16  ;;  %v100_v15 = vadd.s32 %v99_v22, %v89_v21 }
  0x9c   :  { %v123_v27 = vadd.s32 %v122_v24, %v113_v23  ;;  %v101_v28 = vadd.s32 %v100_v15, %v91_v26 }
  0x9e   :  { %v127_v29 = vadd.s32 1, %v123_v27  ;;  %vm126_vm10 = vc.u32 %v101_v28, %v120_v1  ;;  %v125_v42 = vadd.s32 %v120_v1, %v101_v28 }
  0xa0   :  { %v128_v31 = vsel %vm126_vm10, %v127_v29, %v123_v27 }
  0xa1   :  { %v129_v32 = vadd.s32 %v128_v31, %v124_v30 }
  0xa3   :  { %v130_v33 = vadd.s32 536870912, %v129_v32 }
  0xa5   :  { %v131_v34 = vshrl.u32 %v130_v33, 30 }
  0xa7   :  { %v132_v35 = vshll.u32 %v131_v34, 30  ;;  %v155_v55 = vsub.s32 4, %v131_v34 }
  0xa9   :  { %v133_v36 = vsub.s32 %v129_v32, %v132_v35  ;;  %v156_v60 = vsel %vm33_vm13, %v155_v55, %v131_v34 }
  0xaa   :  { %v158_v63 = vsel %vm32_vm14, 0, %v156_v60 }
  0xab   :  { %vm134_vm11 = vcmp.lt.s32.totalorder %v133_v36, 0  ;;  %v135_v38 = vsub.s32 0, %v133_v36  ;;  %v175_v5 = vadd.s32 3, %v158_v63 }
  0xad   :  { %v136_v39 = vsel %vm134_vm11, %v135_v38, %v133_v36  ;;  %v176_v11 = vand.u32 3, %v175_v5 }
  0xae   :  { %v137_v40 = vclz %v136_v39 }
  0xaf   :  { %vm178_vm15 = vcmp.eq.s32.totalorder %v176_v11, 0  ;;  %vm181_vm0 = vcmp.eq.s32.totalorder %v176_v11, 2  ;;  %vm177_vm1 = vcmp.lt.s32.totalorder %v176_v11, 2 }
  0xb0   :  { %v211_v41 = vadd.s32 4294967294, %v137_v40 }
  0xb2   :  { %vm212_vm12 = vcmp.lt.s32.totalorder %v211_v41, 0 }
  0xb3   :  { %v140_v17 = vsel %vm212_vm12, 0, %v211_v41 }
  0xb4   :  { %v141_v43 = vsub.s32 32, %v140_v17  ;;  %v145_v44 = vsub.s32 4294967266, %v140_v17  ;;  %v142_v45 = vshll.u32 %v133_v36, %v140_v17 }
  0xb6   :  { %v143_v46 = vshrl.u32 %v125_v42, %v141_v43  ;;  %v146_v37 = vadd.s32 127, %v145_v44 }
  0xb8   :  { %v144_v47 = vor.u32 %v143_v46, %v142_v45  ;;  %v147_v48 = vshll.u32 %v146_v37, 23 }
  0xba   :  { %v148_v49 = vor.u32 4788187, %v147_v48  ;;  %v151_v51 = vcvt.s32.f32 %v144_v47 }
  0xbc   :  { %v149_v50 = vand.u32 2147483647, %v148_v49 }
  0xbe   :  { %v152_v52 = vmul.f32 %v151_v51, %v149_v50 }
  0xc0   :  { %v153_v53 = vxor.u32 2147483648, %v152_v52 }
  0xc2   :  { %v154_v54 = vsel %vm33_vm13, %v153_v53, %v152_v52 }
  0xc3   :  { %v157_v56 = vsel %vm32_vm14, %v290_v6, %v154_v54 }
  0xc4   :  { %v159_v57 = vmul.f32 %v157_v56, %v157_v56 }
  0xc6   :  { %v160_v58 = vmul.f32 -0.001358992, %v159_v57  ;;  %v167_v59 = vmul.f32 -0.00019511016, %v159_v57 }
  0xc8   :  { %v161_v61 = vadd.f32 0.041655596, %v160_v58  ;;  %v168_v62 = vadd.f32 0.008332121, %v167_v59 }
  0xca   :  { %v162_v0 = vmul.f32 %v161_v61, %v159_v57  ;;  %v169_v2 = vmul.f32 %v168_v62, %v159_v57 }
  0xcc   :  { %v163_v3 = vadd.f32 -0.4999988, %v162_v0  ;;  %v170_v4 = vadd.f32 -0.16666654, %v169_v2 }
  0xce   :  { %v164_v7 = vmul.f32 %v163_v3, %v159_v57  ;;  %v171_v8 = vmul.f32 %v170_v4, %v159_v57 }
  0xd0   :  { %v165_v9 = vadd.f32 1.0, %v164_v7  ;;  %v172_v10 = vadd.f32 1.0, %v171_v8 }
  0xd2   :  { %v173_v12 = vmul.f32 %v172_v10, %v157_v56  ;;  %v182_v13 = vxor.u32 2147483648, %v165_v9 }
  0xd4   :  { %v179_v14 = vxor.u32 2147483648, %v173_v12  ;;  %v183_v18 = vsel %vm181_vm0, %v182_v13, %v173_v12 }
  0xd6   :  { %v180_v16 = vsel %vm178_vm15, %v165_v9, %v179_v14 }
  0xd7   :  { %v184_v19 = vsel %vm177_vm1, %v180_v16, %v183_v18 }
  0xd8   :  { %v185_v20 = vsel %vm174_vm2, nan, %v184_v19 }
  0xd9   :  { %189 = vrot.lane.b32.xlu0 %v185_v20, %s258_s0 }
 0x14b   :  { %v190_v21 = vpop.permute.xlu0 %189 }
 0x14c   :  { %193 = vst.msk [vmem:[#allocation2] sm:$0x3] %vm192_vm3, %v190_v21 }
 0x14d   :  { %204 = dma.vmem_to_hbm [thread:$0]  %s200_s2, 32, %s202_s20, [#allocation3]  }
 0x14e   :  { %249 = dma.done.wait [#allocation3], 32  }
 0x14f   :  { %250 = vsyncadd [#allocation3], 4294967264 }
 0x150   :  { %209 = vsyncpa [#allocation3], 1 }

</bundles_post_ra>
